<compile_context>
chip_gen: v6e
topology: v6e:2x2x1
jax: 0.10.0
libtpu: 0.0.40
codegen_flags: <defaults>
</compile_context>

<pallas_src>
import functools

import jax
import jax.numpy as jnp
from jax.experimental import pallas as pl
from jax.experimental.pallas import tpu as pltpu

HIDDEN_LAYER_DIM = 200
NUM_OUTPUT_CATS = 15
INPUT_DIM = 32               # stand-in for XsNoId.shape[1]

# TPU-friendly padded sizes (lane-dense multiples of 128).
HIDDEN_PAD = 256             # 200 -> 256
OUT_PAD = 128                # 15  -> 128

_NEG_LARGE = -1e30           # baked into padded b3 lanes -> masks padded logits


def net_kernel(x_ref, w1_ref, b1_ref, w2_ref, b2_ref, w3_ref, b3_ref, o_ref):
    # x tile arrives f32 straight from HBM; cast to bf16 on the VPU here
    # (hidden under the MXU) instead of paying a separate XLA pass outside.
    x = x_ref[...].astype(w1_ref.dtype)

    # fc1 + relu: MXU accumulates in f32; elementwise stays f32.
    h1 = jnp.dot(x, w1_ref[...], preferred_element_type=jnp.float32) + b1_ref[...]
    h1 = jnp.maximum(h1, 0.0)

    # fc2 + relu
    h2 = jnp.dot(h1.astype(w2_ref.dtype), w2_ref[...],
                 preferred_element_type=jnp.float32) + b2_ref[...]
    h2 = jnp.maximum(h2, 0.0)

    # fc4 -> logits (padded to OUT_PAD lanes).  The padded lanes of b3 are
    # pre-set to a large negative in init_params (w3's padded columns are 0),
    # so the bias add produces already-masked logits -- no iota/where needed.
    logits = jnp.dot(h2.astype(w3_ref.dtype), w3_ref[...],
                     preferred_element_type=jnp.float32) + b3_ref[...]

    # Numerically-stable log_softmax over last axis (f32 math, bf16 store).
    m = jnp.max(logits, axis=-1, keepdims=True)
    shifted = logits - m
    lse = jnp.log(jnp.sum(jnp.exp(shifted), axis=-1, keepdims=True))
    o_ref[...] = (shifted - lse).astype(o_ref.dtype)


def _choose_block_batch(batch):
    """Batch tile: big enough to amortize ~0.35us/step grid overhead, but at
    least 2 grid steps on larger batches so v7x's 2 TCs both get work."""
    pb8 = ((batch + 7) // 8) * 8          # sublane multiple
    if pb8 <= 8:
        return 8
    steps = max(2, pl.cdiv(pb8, 1024))    # target ~1024 rows / tile
    return min(1024, ((pl.cdiv(pb8, steps) + 7) // 8) * 8)


@functools.partial(jax.jit, static_argnames=("block_batch",))
def net_forward(x, params, *, block_batch=None):
    """x: (batch, INPUT_DIM) f32. Returns (batch, NUM_OUTPUT_CATS) bf16 log-probs."""
    w1, b1, w2, b2, w3, b3 = params
    batch, in_dim = x.shape
    if block_batch is None:
        block_batch = _choose_block_batch(batch)

    # Pad batch to a multiple of the batch tile; padded rows are dropped below.
    padded_batch = pl.cdiv(batch, block_batch) * block_batch
    if padded_batch != batch:
        x = jnp.pad(x, ((0, padded_batch - batch), (0, 0)))
    # NOTE: x stays f32 here; the bf16 cast happens inside the kernel.

    wmap = lambda i: (0, 0)    # weights/biases: same block every step -> VMEM-resident

    out = pl.pallas_call(
        net_kernel,
        out_shape=jax.ShapeDtypeStruct((padded_batch, OUT_PAD), jnp.bfloat16),
        grid_spec=pltpu.PrefetchScalarGridSpec(
            num_scalar_prefetch=0,
            grid=(padded_batch // block_batch,),
            in_specs=[
                pl.BlockSpec((block_batch, in_dim), lambda i: (i, 0)),
                pl.BlockSpec(w1.shape, wmap),
                pl.BlockSpec(b1.shape, wmap),
                pl.BlockSpec(w2.shape, wmap),
                pl.BlockSpec(b2.shape, wmap),
                pl.BlockSpec(w3.shape, wmap),
                pl.BlockSpec(b3.shape, wmap),
            ],
            out_specs=pl.BlockSpec((block_batch, OUT_PAD), lambda i: (i, 0)),
        ),
        compiler_params=pltpu.CompilerParams(
            # batch tiles are independent -> shard across v7x's 2 TensorCores
            dimension_semantics=("parallel",),
            # headroom for large batch tiles (v5e's scoped default is 16 MiB);
            # kept <= ~48 MiB for v7x's 64 MiB physical VMEM.
            vmem_limit_bytes=48 * 1024 * 1024,
        ),
    )(x, w1, b1, w2, b2, w3, b3)

    return out[:batch, :NUM_OUTPUT_CATS]


def init_params(key, dtype=jnp.bfloat16):
    """PyTorch-style init on the real dims, then zero-pad to TPU-friendly dims.
    The padded output columns of b3 get -1e30 so they fall out of the softmax."""
    k1, k2, k3, k4, k5, k6 = jax.random.split(key, 6)

    def linear(kw, kb, fan_in, fan_out, fan_in_pad, fan_out_pad, bias_pad=0.0):
        bound = 1.0 / float(fan_in) ** 0.5
        w = jax.random.uniform(kw, (fan_in, fan_out), jnp.float32, -bound, bound)
        b = jax.random.uniform(kb, (1, fan_out), jnp.float32, -bound, bound)
        # Zero weight padding keeps padded hidden lanes at exactly 0 through ReLU.
        w = jnp.pad(w, ((0, fan_in_pad - fan_in), (0, fan_out_pad - fan_out)))
        b = jnp.pad(b, ((0, 0), (0, fan_out_pad - fan_out)), constant_values=bias_pad)
        return w.astype(dtype), b.astype(jnp.float32)

    w1, b1 = linear(k1, k2, INPUT_DIM, HIDDEN_LAYER_DIM, INPUT_DIM, HIDDEN_PAD)
    w2, b2 = linear(k3, k4, HIDDEN_LAYER_DIM, HIDDEN_LAYER_DIM, HIDDEN_PAD, HIDDEN_PAD)
    w3, b3 = linear(k5, k6, HIDDEN_LAYER_DIM, NUM_OUTPUT_CATS, HIDDEN_PAD, OUT_PAD,
                    bias_pad=_NEG_LARGE)
    return (w1, b1, w2, b2, w3, b3)


def net_reference(x, params):
    """Pure-JAX reference with the same bf16/f32 mixed precision (f32 output)."""
    w1, b1, w2, b2, w3, b3 = params
    xb = x.astype(w1.dtype)
    h1 = jnp.maximum(jnp.dot(xb, w1, preferred_element_type=jnp.float32) + b1, 0.0)
    h2 = jnp.maximum(
        jnp.dot(h1.astype(w2.dtype), w2, preferred_element_type=jnp.float32) + b2, 0.0)
    logits = (jnp.dot(h2.astype(w3.dtype), w3, preferred_element_type=jnp.float32)
              + b3)[:, :NUM_OUTPUT_CATS]
    return jax.nn.log_softmax(logits, axis=-1)


if __name__ == "__main__":
    key = jax.random.PRNGKey(0)
    kx, kp = jax.random.split(key)
    params = init_params(kp)

    # batch=8: single tile.  batch=20: exercises batch padding + a 2-step grid.
    for batch in (8, 20):
        x = jax.random.normal(jax.random.fold_in(kx, batch),
                              (batch, INPUT_DIM), jnp.float32)
        out = jax.block_until_ready(net_forward(x, params))

        # shape + log_softmax normalization sanity (bf16 output -> loose tol)
        assert out.shape == (batch, NUM_OUTPUT_CATS)
        out_f32 = out.astype(jnp.float32)
        row_sums = jnp.sum(jnp.exp(out_f32), axis=-1)
        assert bool(jnp.all(jnp.abs(row_sums - 1.0) < 2e-2))

        # matches the pure-JAX mixed-precision reference (bf16 store rounding)
        ref = net_reference(x, params)
        assert bool(jnp.max(jnp.abs(out_f32 - ref)) < 3e-2)

    print("KERNEL_OK")
</pallas_src>

<mosaic_0001>
module attributes {stable_mosaic.version = 11 : i64} {
  func.func @net_kernel(%arg0: i32, %arg1: memref<8x32xf32, #tpu.memory_space<vmem>>, %arg2: memref<32x256xbf16, #tpu.memory_space<vmem>>, %arg3: memref<1x256xf32, #tpu.memory_space<vmem>>, %arg4: memref<256x256xbf16, #tpu.memory_space<vmem>>, %arg5: memref<1x256xf32, #tpu.memory_space<vmem>>, %arg6: memref<256x128xbf16, #tpu.memory_space<vmem>>, %arg7: memref<1x128xf32, #tpu.memory_space<vmem>>, %arg8: memref<8x128xbf16, #tpu.memory_space<vmem>>) attributes {dimension_semantics = [#tpu.dimension_semantics<parallel>], iteration_bounds = array<i64: 1>, scalar_prefetch = 0 : i64, scratch_operands = 0 : i64, tpu.core_type = #tpu.core_type<tc>, window_params = [{transform_indices = @transform_0, window_bounds = array<i64: 8, 32>}, {pipeline_mode = #tpu.pipeline_mode<synchronous>, transform_indices = @transform_1, window_bounds = array<i64: 32, 256>}, {pipeline_mode = #tpu.pipeline_mode<synchronous>, transform_indices = @transform_2, window_bounds = array<i64: 1, 256>}, {pipeline_mode = #tpu.pipeline_mode<synchronous>, transform_indices = @transform_3, window_bounds = array<i64: 256, 256>}, {pipeline_mode = #tpu.pipeline_mode<synchronous>, transform_indices = @transform_4, window_bounds = array<i64: 1, 256>}, {pipeline_mode = #tpu.pipeline_mode<synchronous>, transform_indices = @transform_5, window_bounds = array<i64: 256, 128>}, {pipeline_mode = #tpu.pipeline_mode<synchronous>, transform_indices = @transform_6, window_bounds = array<i64: 1, 128>}, {transform_indices = @transform_7, window_bounds = array<i64: 8, 128>}]} {
    %c0 = arith.constant 0 : index
    %c0_0 = arith.constant 0 : index
    %0 = vector.load %arg1[%c0, %c0_0] : memref<8x32xf32, #tpu.memory_space<vmem>>, vector<8x32xf32>
    %1 = arith.truncf %0 : vector<8x32xf32> to vector<8x32xbf16>
    %c0_1 = arith.constant 0 : index
    %c0_2 = arith.constant 0 : index
    %2 = vector.load %arg2[%c0_1, %c0_2] : memref<32x256xbf16, #tpu.memory_space<vmem>>, vector<32x256xbf16>
    %cst = arith.constant dense<0.000000e+00> : vector<8x256xf32>
    %3 = tpu.matmul %1, %2, %cst {dimension_numbers = #tpu.dot_dimension_numbers<[1], [0], [0], [1], [0, 0, 1, 1], [], []>} : vector<8x32xbf16>, vector<32x256xbf16>, vector<8x256xf32> -> vector<8x256xf32>
    %c0_3 = arith.constant 0 : index
    %c0_4 = arith.constant 0 : index
    %4 = vector.load %arg3[%c0_3, %c0_4] : memref<1x256xf32, #tpu.memory_space<vmem>>, vector<1x256xf32>
    %5 = vector.broadcast %4 : vector<1x256xf32> to vector<8x256xf32>
    %6 = arith.addf %3, %5 : vector<8x256xf32>
    %cst_5 = arith.constant 0.000000e+00 : f32
    %7 = vector.broadcast %cst_5 : f32 to vector<8x256xf32>
    %8 = arith.maximumf %6, %7 : vector<8x256xf32>
    %9 = arith.truncf %8 : vector<8x256xf32> to vector<8x256xbf16>
    %c0_6 = arith.constant 0 : index
    %c0_7 = arith.constant 0 : index
    %10 = vector.load %arg4[%c0_6, %c0_7] : memref<256x256xbf16, #tpu.memory_space<vmem>>, vector<256x256xbf16>
    %cst_8 = arith.constant dense<0.000000e+00> : vector<8x256xf32>
    %11 = tpu.matmul %9, %10, %cst_8 {dimension_numbers = #tpu.dot_dimension_numbers<[1], [0], [0], [1], [0, 0, 1, 1], [], []>} : vector<8x256xbf16>, vector<256x256xbf16>, vector<8x256xf32> -> vector<8x256xf32>
    %c0_9 = arith.constant 0 : index
    %c0_10 = arith.constant 0 : index
    %12 = vector.load %arg5[%c0_9, %c0_10] : memref<1x256xf32, #tpu.memory_space<vmem>>, vector<1x256xf32>
    %13 = vector.broadcast %12 : vector<1x256xf32> to vector<8x256xf32>
    %14 = arith.addf %11, %13 : vector<8x256xf32>
    %cst_11 = arith.constant 0.000000e+00 : f32
    %15 = vector.broadcast %cst_11 : f32 to vector<8x256xf32>
    %16 = arith.maximumf %14, %15 : vector<8x256xf32>
    %17 = arith.truncf %16 : vector<8x256xf32> to vector<8x256xbf16>
    %c0_12 = arith.constant 0 : index
    %c0_13 = arith.constant 0 : index
    %18 = vector.load %arg6[%c0_12, %c0_13] : memref<256x128xbf16, #tpu.memory_space<vmem>>, vector<256x128xbf16>
    %cst_14 = arith.constant dense<0.000000e+00> : vector<8x128xf32>
    %19 = tpu.matmul %17, %18, %cst_14 {dimension_numbers = #tpu.dot_dimension_numbers<[1], [0], [0], [1], [0, 0, 1, 1], [], []>} : vector<8x256xbf16>, vector<256x128xbf16>, vector<8x128xf32> -> vector<8x128xf32>
    %c0_15 = arith.constant 0 : index
    %c0_16 = arith.constant 0 : index
    %20 = vector.load %arg7[%c0_15, %c0_16] : memref<1x128xf32, #tpu.memory_space<vmem>>, vector<1x128xf32>
    %21 = vector.broadcast %20 : vector<1x128xf32> to vector<8x128xf32>
    %22 = arith.addf %19, %21 : vector<8x128xf32>
    %cst_17 = arith.constant dense<0xFF800000> : vector<8xf32>
    %23 = vector.multi_reduction <maximumf>, %22, %cst_17 [1] : vector<8x128xf32> to vector<8xf32>
    %24 = vector.shape_cast %23 : vector<8xf32> to vector<8x1xf32>
    %25 = vector.broadcast %24 : vector<8x1xf32> to vector<8x128xf32>
    %26 = arith.subf %22, %25 : vector<8x128xf32>
    %27 = math.exp %26 : vector<8x128xf32>
    %cst_18 = arith.constant dense<0.000000e+00> : vector<8xf32>
    %28 = vector.multi_reduction <add>, %27, %cst_18 [1] : vector<8x128xf32> to vector<8xf32>
    %29 = vector.shape_cast %28 : vector<8xf32> to vector<8x1xf32>
    %30 = math.log %29 : vector<8x1xf32>
    %31 = vector.broadcast %30 : vector<8x1xf32> to vector<8x128xf32>
    %32 = arith.subf %26, %31 : vector<8x128xf32>
    %33 = arith.truncf %32 : vector<8x128xf32> to vector<8x128xbf16>
    %c0_19 = arith.constant 0 : index
    %c0_20 = arith.constant 0 : index
    %34 = vector.load %arg8[%c0_19, %c0_20] : memref<8x128xbf16, #tpu.memory_space<vmem>>, vector<8x128xbf16>
    tpu.vector_store %arg8[%c0_19, %c0_20], %33 {strides = array<i32>} : memref<8x128xbf16, #tpu.memory_space<vmem>>, vector<8x128xbf16>,
    return
  }
  func.func @transform_0(%arg0: i32) -> (i32, i32) {
    %c0_i32 = arith.constant 0 : i32
    %c0_i32_0 = arith.constant 0 : i32
    return %arg0, %c0_i32 : i32, i32
  }
  func.func @transform_1(%arg0: i32) -> (i32, i32) {
    %c0_i32 = arith.constant 0 : i32
    %c0_i32_0 = arith.constant 0 : i32
    %c0_i32_1 = arith.constant 0 : i32
    return %c0_i32, %c0_i32_0 : i32, i32
  }
  func.func @transform_2(%arg0: i32) -> (i32, i32) {
    %c0_i32 = arith.constant 0 : i32
    %c0_i32_0 = arith.constant 0 : i32
    %c0_i32_1 = arith.constant 0 : i32
    return %c0_i32, %c0_i32_0 : i32, i32
  }
  func.func @transform_3(%arg0: i32) -> (i32, i32) {
    %c0_i32 = arith.constant 0 : i32
    %c0_i32_0 = arith.constant 0 : i32
    %c0_i32_1 = arith.constant 0 : i32
    return %c0_i32, %c0_i32_0 : i32, i32
  }
  func.func @transform_4(%arg0: i32) -> (i32, i32) {
    %c0_i32 = arith.constant 0 : i32
    %c0_i32_0 = arith.constant 0 : i32
    %c0_i32_1 = arith.constant 0 : i32
    return %c0_i32, %c0_i32_0 : i32, i32
  }
  func.func @transform_5(%arg0: i32) -> (i32, i32) {
    %c0_i32 = arith.constant 0 : i32
    %c0_i32_0 = arith.constant 0 : i32
    %c0_i32_1 = arith.constant 0 : i32
    return %c0_i32, %c0_i32_0 : i32, i32
  }
  func.func @transform_6(%arg0: i32) -> (i32, i32) {
    %c0_i32 = arith.constant 0 : i32
    %c0_i32_0 = arith.constant 0 : i32
    %c0_i32_1 = arith.constant 0 : i32
    return %c0_i32, %c0_i32_0 : i32, i32
  }
  func.func @transform_7(%arg0: i32) -> (i32, i32) {
    %c0_i32 = arith.constant 0 : i32
    %c0_i32_0 = arith.constant 0 : i32
    return %arg0, %c0_i32 : i32, i32
  }
}

</mosaic_0001>

<bundles_post_ra>
// kernel: net_forward.1
= control target key start
LH: loop header
LB: loop body
LE: loop exit
PB: predicated region body
PF: predicated region fallthrough
CT: control target
= control target key end

     0   :  { %12 = vsyncpa [#allocation3], 0  ;;  %s963_s0 = inlined_call_operand.hbm [shape: f32[8,32], index: 0, kind: input, shape index: {}]   ;;  %s964_s1 = inlined_call_operand.hbm [shape: bf16[32,256], index: 1, kind: input, shape index: {}]   ;;  %s965_s2 = inlined_call_operand.vmem [shape: f32[1,256], index: 2, kind: input, shape index: {}]   ;;  %s966_s3 = inlined_call_operand.hbm [shape: bf16[256,256], index: 3, kind: input, shape index: {}]   ;;  %s967_s4 = inlined_call_operand.vmem [shape: f32[1,256], index: 4, kind: input, shape index: {}]   ;;  %s968_s5 = inlined_call_operand.hbm [shape: bf16[256,128], index: 5, kind: input, shape index: {}]   ;;  %s969_s6 = inlined_call_operand.vmem [shape: f32[1,128], index: 6, kind: input, shape index: {}]   ;;  %s970_s7 = inlined_call_operand.hbm [shape: bf16[8,128], index: 7, kind: output, shape index: {}]  }
   0x1   :  { %13 = vsyncpa [#allocation6], 0 }
   0x2   :  { %14 = vsyncpa [#allocation9], 0 }
   0x3   :  { %15 = vsyncpa [#allocation4], 0  ;;  %s889_s24 = smov [#allocation5]  }
   0x4   :  { %s31_s25 = sshll.u32 %s889_s24, 4  ;;  %s32_s25 = int_to_ptr.vmem [resolvable:$true] %s31_s25 }
   0x5   :  { %s789_s26 = scalar_lea.vmem %s32_s25, 512  ;;  %p794_p1 = scmp.lt.s32.totalorder %s32_s25, %s32_s25 }
   0x6   :  { %p790_p0 = scmp.ne.s32.totalorder %s32_s25, %s789_s26  ;;  %p795_p2 = scmp.lt.s32.totalorder %s789_s26, %s789_s26 }
   0x8   :  { %p796_p3 = por %p795_p2, %p794_p1 }
   0xa   :  { %p797_p4 = pnand %p796_p3, %p790_p0 }
   0xc   :  { %800 = shalt.err (!%p797_p4)
}
   0xd   :  { %s890_s27 = smov 128   ;;  %s891_s28 = smov 8  }
   0xe   :  { %37 = dma.hbm_to_vmem [thread:$0]  %s964_s1, 512, %s32_s25, [#allocation6], %s890_s27, %s890_s27, %s891_s28  }
   0xf   :  { %s892_s8 = smov [#allocation2]   ;;  %s893_s10 = smov [#allocation7]  }
  0x10   :  { %s22_s9 = sshll.u32 %s892_s8, 4  ;;  %s45_s11 = sshll.u32 %s893_s10, 4  ;;  %s23_s9 = int_to_ptr.vmem [resolvable:$true] %s22_s9  ;;  %s46_s11 = int_to_ptr.vmem [resolvable:$true] %s45_s11 }
  0x11   :  { %s809_s12 = scalar_lea.vmem %s23_s9, 128  ;;  %p814_p6 = scmp.lt.s32.totalorder %s23_s9, %s23_s9 }
  0x12   :  { %p810_p5 = scmp.ne.s32.totalorder %s23_s9, %s809_s12  ;;  %p815_p7 = scmp.lt.s32.totalorder %s809_s12, %s809_s12 }
  0x14   :  { %p816_p8 = por %p815_p7, %p814_p6 }
  0x16   :  { %p817_p9 = pnand %p816_p8, %p810_p5 }
  0x18   :  { %820 = shalt.err (!%p817_p9)
}
  0x19   :  { %25 = dma.hbm_to_vmem [thread:$0]  %s963_s0, 128, %s23_s9, [#allocation3]  }
  0x1a   :  { %s829_s15 = scalar_lea.vmem %s46_s11, 4096  ;;  %p834_p11 = scmp.lt.s32.totalorder %s46_s11, %s46_s11 }
  0x1b   :  { %p830_p10 = scmp.ne.s32.totalorder %s46_s11, %s829_s15  ;;  %p835_p12 = scmp.lt.s32.totalorder %s829_s15, %s829_s15 }
  0x1d   :  { %p836_p13 = por %p835_p12, %p834_p11 }
  0x1f   :  { %p837_p0 = pnand %p836_p13, %p830_p10 }
  0x21   :  { %840 = shalt.err (!%p837_p0)
}
  0x22   :  { %51 = dma.hbm_to_vmem [thread:$0]  %s966_s3, 4096, %s46_s11, [#allocation6], %s890_s27, %s890_s27, %s891_s28  }
  0x23   :  { %s894_s17 = smov [#allocation8]  }
  0x24   :  { %s59_s18 = sshll.u32 %s894_s17, 4  ;;  %s60_s18 = int_to_ptr.vmem [resolvable:$true] %s59_s18 }
  0x25   :  { %s849_s19 = scalar_lea.vmem %s60_s18, 2048  ;;  %p854_p2 = scmp.lt.s32.totalorder %s60_s18, %s60_s18 }
  0x26   :  { %p850_p1 = scmp.ne.s32.totalorder %s60_s18, %s849_s19  ;;  %p855_p3 = scmp.lt.s32.totalorder %s849_s19, %s849_s19 }
  0x28   :  { %p856_p4 = por %p855_p3, %p854_p2 }
  0x2a   :  { %p857_p5 = pnand %p856_p4, %p850_p1 }
  0x2c   :  { %860 = shalt.err (!%p857_p5)
}
  0x2d   :  { %s895_s0 = smov 64   ;;  %s896_s20 = smov 4  }
  0x2e   :  { %65 = dma.hbm_to_vmem [thread:$0]  %s968_s5, 2048, %s60_s18, [#allocation9], %s895_s0, %s895_s0, %s896_s20  }
  0x2f   :  { %881 = dma.done.wait [#allocation3], 128  }
  0x30   :  { %882 = vsyncadd [#allocation3], 4294967168 }
  0x31   :  { %883 = dma.done.wait [#allocation6], 4608  }
  0x32   :  { %884 = vsyncadd [#allocation6], 4294962688 }
  0x33   :  { %885 = dma.done.wait [#allocation9], 2048  }
  0x34   :  { %886 = vsyncadd [#allocation9], 4294965248  ;;  %v897_v0 = vmov 0   ;;  %v707_v1 = vld [vmem:[#allocation5 + $0x14] ss:$8 sps:$4 sm:$0xff]   ;;  %vm119_vm0 = vcmask 261120   ;;  %v89_v51 = vlaneseq }
  0x35   :  { %155 = vmatprep.mubr.bf16.mxu0 %v897_v0  ;;  %v709_v2 = vld [vmem:[#allocation5 + $0x10] ss:$8 sps:$4 sm:$0xff]   ;;  %135 = vmatprep.subr.bf16.mxu0 %v707_v1  ;;  %v710_v3 = vld [vmem:[#allocation5 + $0x4] ss:$8 sps:$4 sm:$0xff]   ;;  %v712_v4 = vld [vmem:[#allocation5] ss:$8 sps:$4 sm:$0xff]  }
  0x36   :  { %v81_v5 = vld [vmem:[#allocation2] sm:$0xff]  ;;  %136 = vmatpush1.bf16.msra.mxu0 %v709_v2  ;;  %v716_v8 = vld [vmem:[#allocation7 + $0x64] ss:$8 sps:$4 sm:$0xff]   ;;  %v718_v10 = vld [vmem:[#allocation7 + $0x60] ss:$8 sps:$4 sm:$0xff]   ;;  %v90_v52 = vshrl.u32 %v89_v51, 7 }
  0x37   :  { %v713_v6 = vld [vmem:[#allocation7 + $0x74] ss:$8 sps:$4 sm:$0xff]   ;;  %137 = vmatprep.subr.bf16.mxu0 %v710_v3  ;;  %v715_v7 = vld [vmem:[#allocation7 + $0x70] ss:$8 sps:$4 sm:$0xff]   ;;  %v82_v9 = vpack.c.bf16 %v81_v5, %v81_v5  ;;  %v722_v13 = vld [vmem:[#allocation7 + $0x44] ss:$8 sps:$4 sm:$0xff]  }
  0x38   :  { %372 = vmatprep.subr.bf16.mxu1 %v713_v6  ;;  %v719_v11 = vld [vmem:[#allocation7 + $0x54] ss:$8 sps:$4 sm:$0xff]   ;;  %v721_v12 = vld [vmem:[#allocation7 + $0x50] ss:$8 sps:$4 sm:$0xff]   ;;  %v724_v14 = vld [vmem:[#allocation7 + $0x40] ss:$8 sps:$4 sm:$0xff]  }
  0x39   :  { %373 = vmatpush1.bf16.msra.mxu1 %v715_v7  ;;  %v725_v15 = vld [vmem:[#allocation7 + $0x34] ss:$8 sps:$4 sm:$0xff]   ;;  %v727_v16 = vld [vmem:[#allocation7 + $0x30] ss:$8 sps:$4 sm:$0xff]   ;;  %v728_v17 = vld [vmem:[#allocation7 + $0x24] ss:$8 sps:$4 sm:$0xff]  }
  0x3a   :  { %138 = vmatpush1.bf16.msra.mxu0 %v712_v4  ;;  %374 = vmatprep.subr.bf16.mxu1 %v716_v8  ;;  %v730_v18 = vld [vmem:[#allocation7 + $0x20] ss:$8 sps:$4 sm:$0xff]   ;;  %v731_v19 = vld [vmem:[#allocation7 + $0x14] ss:$8 sps:$4 sm:$0xff]   ;;  %v733_v20 = vld [vmem:[#allocation7 + $0x10] ss:$8 sps:$4 sm:$0xff]  }
  0x3b   :  { %v734_v21 = vld [vmem:[#allocation7 + $0x4] ss:$8 sps:$4 sm:$0xff]   ;;  %v736_v22 = vld [vmem:[#allocation7] ss:$8 sps:$4 sm:$0xff]   ;;  %v737_v23 = vld [vmem:[#allocation7 + $0xf4] ss:$8 sps:$4 sm:$0xff]  }
  0x3c   :  { %v739_v24 = vld [vmem:[#allocation7 + $0xf0] ss:$8 sps:$4 sm:$0xff]   ;;  %v740_v25 = vld [vmem:[#allocation7 + $0xe4] ss:$8 sps:$4 sm:$0xff]   ;;  %v742_v26 = vld [vmem:[#allocation7 + $0xe0] ss:$8 sps:$4 sm:$0xff]  }
  0x3d   :  { %625 = vmatmul.mubr.msk.bf16.vlgmr.msra.gmra.mxu0 %vm119_vm0, %v82_v9  ;;  %375 = vmatpush1.bf16.msra.mxu1 %v718_v10  ;;  %v743_v27 = vld [vmem:[#allocation7 + $0xd4] ss:$8 sps:$4 sm:$0xff]   ;;  %v745_v28 = vld [vmem:[#allocation7 + $0xd0] ss:$8 sps:$4 sm:$0xff]   ;;  %v746_v29 = vld [vmem:[#allocation7 + $0xc4] ss:$8 sps:$4 sm:$0xff]  }
  0x3e   :  { %376 = vmatprep.subr.bf16.mxu1 %v719_v11  ;;  %v748_v30 = vld [vmem:[#allocation7 + $0xc0] ss:$8 sps:$4 sm:$0xff]   ;;  %v749_v31 = vld [vmem:[#allocation7 + $0xb4] ss:$8 sps:$4 sm:$0xff]   ;;  %v751_v32 = vld [vmem:[#allocation7 + $0xb0] ss:$8 sps:$4 sm:$0xff]  }
  0x3f   :  { %v752_v33 = vld [vmem:[#allocation7 + $0xa4] ss:$8 sps:$4 sm:$0xff]   ;;  %v754_v34 = vld [vmem:[#allocation7 + $0xa0] ss:$8 sps:$4 sm:$0xff]   ;;  %v755_v35 = vld [vmem:[#allocation7 + $0x94] ss:$8 sps:$4 sm:$0xff]  }
  0x40   :  { %v757_v36 = vld [vmem:[#allocation7 + $0x90] ss:$8 sps:$4 sm:$0xff]   ;;  %v758_v37 = vld [vmem:[#allocation7 + $0x84] ss:$8 sps:$4 sm:$0xff]   ;;  %v760_v38 = vld [vmem:[#allocation7 + $0x80] ss:$8 sps:$4 sm:$0xff]  }
  0x41   :  { %377 = vmatpush1.bf16.msra.mxu1 %v721_v12  ;;  %v761_v39 = vld [vmem:[#allocation8 + $0x78] sm:$0xff]   ;;  %v763_v41 = vld [vmem:[#allocation8 + $0x70] sm:$0xff]   ;;  %v765_v43 = vld [vmem:[#allocation8 + $0x68] sm:$0xff]   ;;  %v91_v53 = vsub.s32 0, %v90_v52  ;;  %v95_v55 = vsub.s32 1, %v90_v52 }
  0x42   :  { %378 = vmatprep.subr.bf16.mxu1 %v722_v13  ;;  %v762_v40 = vld [vmem:[#allocation8 + $0x38] sm:$0xff]   ;;  %675 = vmatprep.subr.bf16.mxu0 %v761_v39  ;;  %v764_v42 = vld [vmem:[#allocation8 + $0x30] sm:$0xff]   ;;  %v766_v44 = vld [vmem:[#allocation8 + $0x28] sm:$0xff]  }
  0x43   :  { %676 = vmatpush3.bf16.msra.mxu0 %v762_v40  ;;  %v767_v45 = vld [vmem:[#allocation8 + $0x60] sm:$0xff]   ;;  %v769_v47 = vld [vmem:[#allocation8 + $0x58] sm:$0xff]   ;;  %v771_v49 = vld [vmem:[#allocation8 + $0x50] sm:$0xff]  }
  0x44   :  { %677 = vmatprep.subr.bf16.mxu0 %v763_v41  ;;  %v768_v46 = vld [vmem:[#allocation8 + $0x20] sm:$0xff]   ;;  %v770_v48 = vld [vmem:[#allocation8 + $0x18] sm:$0xff]   ;;  %v772_v50 = vld [vmem:[#allocation8 + $0x10] sm:$0xff]  }
  0x45   :  { %379 = vmatpush1.bf16.msra.mxu1 %v724_v14  ;;  %v87_v54 = vld [vmem:[%s965_s2] sm:$0x3]  ;;  %v773_v4 = vld [vmem:[#allocation8 + $0x48] sm:$0xff]   ;;  %v775_v6 = vld [vmem:[#allocation8 + $0x40] sm:$0xff]  }
  0x46   :  { %380 = vmatprep.subr.bf16.mxu1 %v725_v15  ;;  %v92_v56 = vrot.slane %v87_v54, %v91_v53  ;;  %v96_v57 = vrot.slane %v87_v54, %v95_v55  ;;  %v774_v5 = vld [vmem:[#allocation8 + $0x8] sm:$0xff]   ;;  %v776_v7 = vld [vmem:[#allocation8] sm:$0xff]   ;;  %v200_v8 = vld [vmem:[%s967_s4] sm:$0x3]  ;;  %s898_s4 = smov [#allocation10]  }
  0x47   :  { %678 = vmatpush3.bf16.msra.mxu0 %v764_v42  ;;  %v205_v9 = vrot.slane %v200_v8, %v91_v53  ;;  %v209_v10 = vrot.slane %v200_v8, %v95_v55  ;;  %s610_s26 = sshll.u32 %s898_s4, 4  ;;  %s611_s26 = int_to_ptr.vmem [resolvable:$true] %s610_s26 }
  0x48   :  { %679 = vmatprep.subr.bf16.mxu0 %v765_v43  ;;  %p866_p7 = scmp.lt.s32.totalorder %s611_s26, %s611_s26 }
  0x49   :  { %381 = vmatpush1.bf16.msra.mxu1 %v727_v16 }
  0x4a   :  { %382 = vmatprep.subr.bf16.mxu1 %v728_v17 }
  0x4b   :  { %680 = vmatpush3.bf16.msra.mxu0 %v766_v44 }
  0x4c   :  { %681 = vmatprep.subr.bf16.mxu0 %v767_v45 }
  0x4d   :  { %383 = vmatpush1.bf16.msra.mxu1 %v730_v18 }
  0x4e   :  { %384 = vmatprep.subr.bf16.mxu1 %v731_v19 }
  0x4f   :  { %682 = vmatpush3.bf16.msra.mxu0 %v768_v46 }
  0x50   :  { %683 = vmatprep.subr.bf16.mxu0 %v769_v47 }
  0x51   :  { %385 = vmatpush1.bf16.msra.mxu1 %v733_v20 }
  0x52   :  { %386 = vmatprep.subr.bf16.mxu1 %v734_v21 }
  0x53   :  { %684 = vmatpush3.bf16.msra.mxu0 %v770_v48 }
  0x54   :  { %685 = vmatprep.subr.bf16.mxu0 %v771_v49 }
  0x55   :  { %387 = vmatpush1.bf16.msra.mxu1 %v736_v22 }
  0x56   :  { %388 = vmatprep.subr.bf16.mxu1 %v737_v23  ;;  %v658_v23 = vld [vmem:[%s969_s6] ss:$0 sm:$0xff]  ;;  %s861_s6 = scalar_lea.vmem %s611_s26, 64 }
  0x57   :  { %686 = vmatpush3.bf16.msra.mxu0 %v772_v50  ;;  %p862_p6 = scmp.ne.s32.totalorder %s611_s26, %s861_s6  ;;  %p867_p8 = scmp.lt.s32.totalorder %s861_s6, %s861_s6 }
  0x58   :  { %687 = vmatprep.subr.bf16.mxu0 %v773_v4 }
  0x59   :  { %389 = vmatpush2.bf16.msra.mxu1 %v739_v24  ;;  %p868_p9 = por %p867_p8, %p866_p7 }
  0x5a   :  { %390 = vmatprep.subr.bf16.mxu1 %v740_v25 }
  0x5b   :  { %688 = vmatpush3.bf16.msra.mxu0 %v774_v5  ;;  %p869_p10 = pnand %p868_p9, %p862_p6 }
  0x5c   :  { %689 = vmatprep.subr.bf16.mxu0 %v775_v6 }
  0x5d   :  { %391 = vmatpush2.bf16.msra.mxu1 %v742_v26 }
  0x5e   :  { %392 = vmatprep.subr.bf16.mxu1 %v743_v27 }
  0x5f   :  { %690 = vmatpush3.bf16.msra.mxu0 %v776_v7 }
  0x61   :  { %393 = vmatpush2.bf16.msra.mxu1 %v745_v28 }
  0x62   :  { %394 = vmatprep.subr.bf16.mxu1 %v746_v29 }
  0x65   :  { %395 = vmatpush2.bf16.msra.mxu1 %v748_v30 }
  0x66   :  { %396 = vmatprep.subr.bf16.mxu1 %v749_v31 }
  0x69   :  { %397 = vmatpush2.bf16.msra.mxu1 %v751_v32 }
  0x6a   :  { %398 = vmatprep.subr.bf16.mxu1 %v752_v33 }
  0x6d   :  { %399 = vmatpush2.bf16.msra.mxu1 %v754_v34 }
  0x6e   :  { %400 = vmatprep.subr.bf16.mxu1 %v755_v35 }
  0x71   :  { %401 = vmatpush2.bf16.msra.mxu1 %v757_v36 }
  0x72   :  { %402 = vmatprep.subr.bf16.mxu1 %v758_v37 }
  0x75   :  { %403 = vmatpush2.bf16.msra.mxu1 %v760_v38 }
  0xfd   :  { %v157_v58 = vpop.f32.mrf.mxu0 }
  0xfe   :  { %v158_v59 = vadd.f32 %v157_v58, %v92_v56 }
  0xff   :  { %v159_v60 = vpop.f32.mrf.mxu0 }
 0x100   :  { %v160_v61 = vadd.f32 %v159_v60, %v96_v57  ;;  %v164_v62 = vmax.f32 %v158_v59, 0.0 }
 0x101   :  { %v161_v63 = vpop.f32.mrf.mxu0 }
 0x102   :  { %v165_v0 = vmax.f32 %v160_v61, 0.0  ;;  %v166_v3 = vpack.c.bf16 %v164_v62, %v164_v62 }
 0x103   :  { %v162_v1 = vpop.f32.mrf.mxu0 }
 0x104   :  { %v167_v2 = vpack.c.bf16 %v165_v0, %v165_v0 }
 0x106   :  { %404 = vmatprep.mubr.bf16.mxu1 %v167_v2 }
 0x107   :  { %405 = vmatmul.mubr.bf16.vlgmr.msra.gmra.mxu1 %v166_v3 }
 0x1c7   :  { %v406_v11 = vpop.f32.mrf.mxu1 }
 0x1c8   :  { %v407_v12 = vadd.f32 %v406_v11, %v205_v9 }
 0x1c9   :  { %v408_v13 = vpop.f32.mrf.mxu1 }
 0x1ca   :  { %v409_v14 = vadd.f32 %v408_v13, %v209_v10  ;;  %v413_v15 = vmax.f32 %v407_v12, 0.0 }
 0x1cb   :  { %v410_v16 = vpop.f32.mrf.mxu1 }
 0x1cc   :  { %v414_v17 = vmax.f32 %v409_v14, 0.0  ;;  %v415_v20 = vpack.c.bf16 %v413_v15, %v413_v15 }
 0x1cd   :  { %v411_v18 = vpop.f32.mrf.mxu1 }
 0x1ce   :  { %v416_v19 = vpack.c.bf16 %v414_v17, %v414_v17 }
 0x1d0   :  { %584 = vmatprep.mubr.bf16.mxu0 %v416_v19 }
 0x1d1   :  { %585 = vmatmul.mubr.bf16.vlgmr.msra.gmra.mxu0 %v415_v20 }
 0x291   :  { %v691_v21 = vpop.f32.mrf.mxu0 }
 0x293   :  { %v692_v22 = vpop.f32.mrf.mxu0 }
 0x294   :  { %v693_v24 = vadd.f32 %v692_v22, %v691_v21 }
 0x295   :  { %v694_v25 = vpop.f32.mrf.mxu0 }
 0x296   :  { %v587_v26 = vadd.f32 %v693_v24, %v658_v23 }
 0x297   :  { %v695_v27 = vpop.f32.mrf.mxu0 }
 0x298   :  { %592 = vmax.xlane.f32.xlu0 %v587_v26 }
 0x321   :  { %v593_v28 = vpop.xlane.xlu0 %592 }
 0x322   :  { %v594_v29 = vsub.f32 %v587_v26, %v593_v28 }
 0x324   :  { %v595_v30 = vmul.f32 1.442695, %v594_v29 }
 0x326   :  { %777 = vpow2.f32 %v595_v30 }
 0x333   :  { %v778_v31 = vpop.eup %777 }
 0x334   :  { %597 = vadd.xlane.f32.xlu0 %v778_v31 }
 0x3bd   :  { %v598_v32 = vpop.xlane.xlu0 %597 }
 0x3be   :  { %779 = vlog2.f32 %v598_v32 }
 0x3cb   :  { %v780_v33 = vpop.eup %779 }
 0x3cc   :  { %v600_v34 = vmul.f32 0.6931472, %v780_v33 }
 0x3ce   :  { %v601_v35 = vsub.f32 %v594_v29, %v600_v34 }
 0x3d0   :  { %v602_v36 = vpack.c.bf16 %v601_v35, %v601_v35 }
 0x3d2   :  { %603 = vst [vmem:[#allocation10] sm:$0xf] %v602_v36 }
 0x3d3   :  { %872 = shalt.err (!%p869_p10)
}
 0x3d4   :  { %613 = dma.vmem_to_hbm [thread:$0]  %s611_s26, 64, %s970_s7, [#allocation4]  }
 0x3d5   :  { %887 = dma.done.wait [#allocation4], 64  }
 0x3d6   :  { %888 = vsyncadd [#allocation4], 4294967232 }
 0x3d7   :  { %617 = vsyncpa [#allocation3], 1 }
 0x3d8   :  { %618 = vsyncpa [#allocation6], 1 }
 0x3d9   :  { %619 = vsyncpa [#allocation9], 1 }
 0x3da   :  { %620 = vsyncpa [#allocation4], 1 }

</bundles_post_ra>
